<compile_context>
chip_gen: v5e
topology: v5e:2x2
jax: 0.10.0
libtpu: 0.0.40
codegen_flags: <defaults>
</compile_context>

<pallas_src>
import math
import functools

import jax
import jax.numpy as jnp
from jax.experimental import pallas as pl
from jax.experimental.pallas import tpu as pltpu


def _transformer_block_kernel(x_ref, wqkv_ref, bqkv_ref, wo_ref, bo_ref,
                              g1_ref, b1_ref, wff1_ref, bff1_ref,
                              wff2_ref, bff2_ref, g2_ref, b2_ref, o_ref,
                              *, n_head, eps):
    # x_ref: (1, S, E) block for the current batch element.
    x = x_ref[0]                                    # (S, E) f32
    S, E = x.shape
    H = n_head
    D = E // H
    scale = 1.0 / math.sqrt(D)

    # ---- fused QKV: one (S,E)@(E,3E) bf16 matmul, f32 accumulation ---------
    qkv = jnp.dot(x.astype(jnp.bfloat16), wqkv_ref[...],
                  preferred_element_type=jnp.float32) + bqkv_ref[...]  # (S,3E)

    # Split at E-aligned lane boundaries, then free reshape to (S, H, D) and a
    # lane-layout-aware major-dim permute to head-leading (H, S, D).
    q = (qkv[:, 0:E] * scale).reshape(S, H, D)       # fold 1/sqrt(D) once, f32
    k = qkv[:, E:2 * E].reshape(S, H, D)
    v = qkv[:, 2 * E:3 * E].reshape(S, H, D)
    qh = pltpu.einshape("shd->hsd", q).astype(jnp.bfloat16)   # (H, S, D)
    kh = pltpu.einshape("shd->hsd", k).astype(jnp.bfloat16)
    vh = pltpu.einshape("shd->hsd", v).astype(jnp.bfloat16)

    # ---- attention (per batch element; no cross-batch mask needed) ---------
    s = jnp.einsum('hqd,hkd->hqk', qh, kh,
                   preferred_element_type=jnp.float32)         # (H, S, S) f32
    s = s - jnp.max(s, axis=-1, keepdims=True)                 # f32 softmax
    p = jnp.exp(s)
    p = p * pl.reciprocal(jnp.sum(p, axis=-1, keepdims=True), approx=True)
    # TODO(synk): attention-weight dropout (training mode) skipped (eval mode).

    ctx = jnp.einsum('hqk,hkd->hqd', p.astype(jnp.bfloat16), vh,
                     preferred_element_type=jnp.float32)        # (H, S, D) f32
    ctx = pltpu.einshape("hsd->shd", ctx).reshape(S, E)         # heads -> lanes

    # ---- output projection: single contraction over h*d = E ----------------
    attn_out = jnp.dot(ctx.astype(jnp.bfloat16), wo_ref[...],
                       preferred_element_type=jnp.float32) + bo_ref[...]

    # ---- residual + LayerNorm (MultiHeadAttention.norm); dropout = identity
    y = x + attn_out
    mu = jnp.mean(y, axis=-1, keepdims=True)
    var = jnp.mean(jnp.square(y - mu), axis=-1, keepdims=True)
    y = (y - mu) * jax.lax.rsqrt(var + eps) * g1_ref[...] + b1_ref[...]

    # ---- feed-forward: Linear -> ReLU -> (dropout=id) -> Linear ------------
    h1 = jnp.dot(y.astype(jnp.bfloat16), wff1_ref[...],
                 preferred_element_type=jnp.float32) + bff1_ref[...]
    h1 = jnp.maximum(h1, 0.0)
    ff = jnp.dot(h1.astype(jnp.bfloat16), wff2_ref[...],
                 preferred_element_type=jnp.float32) + bff2_ref[...]

    # ---- residual + LayerNorm (TransformerBlock.norm); dropout = identity --
    z = y + ff
    mu2 = jnp.mean(z, axis=-1, keepdims=True)
    var2 = jnp.mean(jnp.square(z - mu2), axis=-1, keepdims=True)
    o_ref[0] = (z - mu2) * jax.lax.rsqrt(var2 + eps) * g2_ref[...] + b2_ref[...]


def transformer_block(x_sbe, params, *, n_head, eps=1e-5):
    """TransformerBlock forward. x_sbe: (S, B, E) float32 -> (S, B, E)."""
    S, B, E = x_sbe.shape
    assert E % n_head == 0

    (wqkv, bqkv, wo, bo, g1, b1, wff1, bff1, wff2, bff2, g2, b2) = params
    F = wff1.shape[1]

    # one HBM-bandwidth layout change so batch can be a parallel grid axis
    x_bse = jnp.transpose(x_sbe, (1, 0, 2))                    # (B, S, E)

    kernel = functools.partial(_transformer_block_kernel, n_head=n_head, eps=eps)

    def wspec(shape):
        # weight stays VMEM-resident: block index constant across the grid
        return pl.BlockSpec(shape, lambda b, _n=len(shape): (0,) * _n)

    out = pl.pallas_call(
        kernel,
        out_shape=jax.ShapeDtypeStruct((B, S, E), jnp.float32),
        grid=(B,),
        in_specs=[
            pl.BlockSpec((1, S, E), lambda b: (b, 0, 0)),      # x (per batch)
            wspec((E, 3 * E)), wspec((1, 3 * E)),              # fused QKV
            wspec((E, E)), wspec((1, E)),                      # out proj
            wspec((1, E)), wspec((1, E)),                      # LN1 gamma/beta
            wspec((E, F)), wspec((1, F)),                      # FFN 1
            wspec((F, E)), wspec((1, E)),                      # FFN 2
            wspec((1, E)), wspec((1, E)),                      # LN2 gamma/beta
        ],
        out_specs=pl.BlockSpec((1, S, E), lambda b: (b, 0, 0)),
        compiler_params=pltpu.CompilerParams(
            dimension_semantics=("parallel",),
            vmem_limit_bytes=32 * 1024 * 1024),
    )(x_bse, wqkv, bqkv, wo, bo, g1, b1, wff1, bff1, wff2, bff2, g2, b2)

    return jnp.transpose(out, (1, 0, 2))                       # (S, B, E)


def init_params(key, d_model, n_head, dim_ff):
    """Params matching nn.MultiheadAttention / LayerNorm / Linear layouts.

    MXU-facing weights are stored transposed (right-multiply) and in bf16;
    biases and LayerNorm params stay f32.
    """
    E, F = d_model, dim_ff
    ks = jax.random.split(key, 8)

    # torch layouts: in_proj_weight (3E, E), out_proj.weight (E, E)
    in_proj_w = jax.random.normal(ks[0], (3 * E, E), jnp.float32) * 0.05
    in_proj_b = jax.random.normal(ks[1], (3 * E,), jnp.float32) * 0.02
    out_proj_w = jax.random.normal(ks[2], (E, E), jnp.float32) * 0.05
    out_proj_b = jax.random.normal(ks[3], (E,), jnp.float32) * 0.02

    wqkv = in_proj_w.T.astype(jnp.bfloat16)          # (E, 3E)
    bqkv = in_proj_b[None, :]                        # (1, 3E) f32
    wo = out_proj_w.T.astype(jnp.bfloat16)           # (E, E)
    bo = out_proj_b[None, :]                         # (1, E)  f32

    gamma1 = jnp.ones((1, E), jnp.float32)           # attention LayerNorm
    beta1 = jnp.zeros((1, E), jnp.float32)

    # torch Linear weight is (out, in); store transposed for right-multiply
    w_ff1 = jax.random.normal(ks[4], (F, E), jnp.float32) * 0.05
    b_ff1 = jax.random.normal(ks[5], (F,), jnp.float32) * 0.02
    w_ff2 = jax.random.normal(ks[6], (E, F), jnp.float32) * 0.05
    b_ff2 = jax.random.normal(ks[7], (E,), jnp.float32) * 0.02

    wff1 = w_ff1.T.astype(jnp.bfloat16)              # (E, F)
    bff1 = b_ff1[None, :]                            # (1, F)
    wff2 = w_ff2.T.astype(jnp.bfloat16)              # (F, E)
    bff2 = b_ff2[None, :]                            # (1, E)

    gamma2 = jnp.ones((1, E), jnp.float32)           # block LayerNorm
    beta2 = jnp.zeros((1, E), jnp.float32)

    return (wqkv, bqkv, wo, bo, gamma1, beta1,
            wff1, bff1, wff2, bff2, gamma2, beta2)


def transformer_block_ref(x_sbe, params, *, n_head, eps=1e-5):
    """Pure-JAX f32 reference (mirrors torch eval-mode semantics)."""
    S, B, E = x_sbe.shape
    D = E // n_head
    (wqkv, bqkv, wo, bo, g1, b1, wff1, bff1, wff2, bff2, g2, b2) = params
    wqkv = wqkv.astype(jnp.float32)
    wo = wo.astype(jnp.float32)
    wff1 = wff1.astype(jnp.float32)
    wff2 = wff2.astype(jnp.float32)

    x = jnp.transpose(x_sbe, (1, 0, 2))                         # (B, S, E)
    qkv = x @ wqkv + bqkv
    q, k, v = qkv[..., :E], qkv[..., E:2 * E], qkv[..., 2 * E:]

    def split(t):                                               # -> (B, H, S, D)
        return jnp.transpose(t.reshape(B, S, n_head, D), (0, 2, 1, 3))

    qh, kh, vh = split(q), split(k), split(v)
    s = jnp.einsum('bhqd,bhkd->bhqk', qh, kh) / math.sqrt(D)
    p = jax.nn.softmax(s, axis=-1)
    ctx = jnp.einsum('bhqk,bhkd->bhqd', p, vh)
    ctx = jnp.transpose(ctx, (0, 2, 1, 3)).reshape(B, S, E)
    attn = ctx @ wo + bo

    def ln(t, g, bb):
        mu = jnp.mean(t, -1, keepdims=True)
        var = jnp.mean((t - mu) ** 2, -1, keepdims=True)
        return (t - mu) * jax.lax.rsqrt(var + eps) * g + bb

    y = ln(x + attn, g1, b1)
    ff = jnp.maximum(y @ wff1 + bff1, 0.0) @ wff2 + bff2
    z = ln(y + ff, g2, b2)
    return jnp.transpose(z, (1, 0, 2))                          # (S, B, E)


if __name__ == "__main__":
    d_model = 32
    n_head = 4
    dim_feedforward = 64
    seq = 8
    batch = 2

    key = jax.random.PRNGKey(0)
    k_x, k_p = jax.random.split(key)
    x = jax.random.normal(k_x, (seq, batch, d_model), jnp.float32)
    params = init_params(k_p, d_model, n_head, dim_feedforward)

    out = transformer_block(x, params, n_head=n_head)
    out = jax.block_until_ready(out)

    assert out.shape == (seq, batch, d_model)
    assert bool(jnp.all(jnp.isfinite(out)))

    ref = transformer_block_ref(x, params, n_head=n_head)
    max_err = float(jnp.max(jnp.abs(out - ref)))
    assert max_err < 5e-2, f"max abs err vs f32 reference: {max_err}"

    print("KERNEL_OK")
</pallas_src>

<mosaic_0001>
module attributes {stable_mosaic.version = 11 : i64} {
  func.func @_transformer_block_kernel(%arg0: i32, %arg1: memref<1x8x32xf32, #tpu.memory_space<vmem>>, %arg2: memref<32x96xbf16, #tpu.memory_space<vmem>>, %arg3: memref<1x96xf32, #tpu.memory_space<vmem>>, %arg4: memref<32x32xbf16, #tpu.memory_space<vmem>>, %arg5: memref<1x32xf32, #tpu.memory_space<vmem>>, %arg6: memref<1x32xf32, #tpu.memory_space<vmem>>, %arg7: memref<1x32xf32, #tpu.memory_space<vmem>>, %arg8: memref<32x64xbf16, #tpu.memory_space<vmem>>, %arg9: memref<1x64xf32, #tpu.memory_space<vmem>>, %arg10: memref<64x32xbf16, #tpu.memory_space<vmem>>, %arg11: memref<1x32xf32, #tpu.memory_space<vmem>>, %arg12: memref<1x32xf32, #tpu.memory_space<vmem>>, %arg13: memref<1x32xf32, #tpu.memory_space<vmem>>, %arg14: memref<1x8x32xf32, #tpu.memory_space<vmem>>) attributes {dimension_semantics = [#tpu.dimension_semantics<parallel>], iteration_bounds = array<i64: 2>, scalar_prefetch = 0 : i64, scratch_operands = 0 : i64, tpu.core_type = #tpu.core_type<tc>, window_params = [{transform_indices = @transform_0, window_bounds = array<i64: 1, 8, 32>}, {pipeline_mode = #tpu.pipeline_mode<synchronous>, transform_indices = @transform_1, window_bounds = array<i64: 32, 96>}, {pipeline_mode = #tpu.pipeline_mode<synchronous>, transform_indices = @transform_2, window_bounds = array<i64: 1, 96>}, {pipeline_mode = #tpu.pipeline_mode<synchronous>, transform_indices = @transform_3, window_bounds = array<i64: 32, 32>}, {pipeline_mode = #tpu.pipeline_mode<synchronous>, transform_indices = @transform_4, window_bounds = array<i64: 1, 32>}, {pipeline_mode = #tpu.pipeline_mode<synchronous>, transform_indices = @transform_5, window_bounds = array<i64: 1, 32>}, {pipeline_mode = #tpu.pipeline_mode<synchronous>, transform_indices = @transform_6, window_bounds = array<i64: 1, 32>}, {pipeline_mode = #tpu.pipeline_mode<synchronous>, transform_indices = @transform_7, window_bounds = array<i64: 32, 64>}, {pipeline_mode = #tpu.pipeline_mode<synchronous>, transform_indices = @transform_8, window_bounds = array<i64: 1, 64>}, {pipeline_mode = #tpu.pipeline_mode<synchronous>, transform_indices = @transform_9, window_bounds = array<i64: 64, 32>}, {pipeline_mode = #tpu.pipeline_mode<synchronous>, transform_indices = @transform_10, window_bounds = array<i64: 1, 32>}, {pipeline_mode = #tpu.pipeline_mode<synchronous>, transform_indices = @transform_11, window_bounds = array<i64: 1, 32>}, {pipeline_mode = #tpu.pipeline_mode<synchronous>, transform_indices = @transform_12, window_bounds = array<i64: 1, 32>}, {transform_indices = @transform_13, window_bounds = array<i64: 1, 8, 32>}]} {
    %c0 = arith.constant 0 : index
    %c0_0 = arith.constant 0 : index
    %c0_1 = arith.constant 0 : index
    %0 = vector.load %arg1[%c0, %c0_0, %c0_1] : memref<1x8x32xf32, #tpu.memory_space<vmem>>, vector<1x8x32xf32>
    %1 = vector.shape_cast %0 : vector<1x8x32xf32> to vector<8x32xf32>
    %2 = arith.truncf %1 : vector<8x32xf32> to vector<8x32xbf16>
    %c0_2 = arith.constant 0 : index
    %c0_3 = arith.constant 0 : index
    %3 = vector.load %arg2[%c0_2, %c0_3] : memref<32x96xbf16, #tpu.memory_space<vmem>>, vector<32x96xbf16>
    %cst = arith.constant dense<0.000000e+00> : vector<8x96xf32>
    %4 = tpu.matmul %2, %3, %cst {dimension_numbers = #tpu.dot_dimension_numbers<[1], [0], [0], [1], [0, 0, 1, 1], [], []>} : vector<8x32xbf16>, vector<32x96xbf16>, vector<8x96xf32> -> vector<8x96xf32>
    %c0_4 = arith.constant 0 : index
    %c0_5 = arith.constant 0 : index
    %5 = vector.load %arg3[%c0_4, %c0_5] : memref<1x96xf32, #tpu.memory_space<vmem>>, vector<1x96xf32>
    %6 = vector.broadcast %5 : vector<1x96xf32> to vector<8x96xf32>
    %7 = arith.addf %4, %6 : vector<8x96xf32>
    %8 = vector.extract_strided_slice %7 {offsets = [0, 0], sizes = [8, 32], strides = [1, 1]} : vector<8x96xf32> to vector<8x32xf32>
    %cst_6 = arith.constant 0.353553385 : f32
    %9 = vector.broadcast %cst_6 : f32 to vector<8x32xf32>
    %10 = arith.mulf %8, %9 : vector<8x32xf32>
    %11 = vector.shape_cast %10 : vector<8x32xf32> to vector<8x4x8xf32>
    %12 = vector.extract_strided_slice %7 {offsets = [0, 32], sizes = [8, 32], strides = [1, 1]} : vector<8x96xf32> to vector<8x32xf32>
    %13 = vector.shape_cast %12 : vector<8x32xf32> to vector<8x4x8xf32>
    %14 = vector.extract_strided_slice %7 {offsets = [0, 64], sizes = [8, 32], strides = [1, 1]} : vector<8x96xf32> to vector<8x32xf32>
    %15 = vector.shape_cast %14 : vector<8x32xf32> to vector<8x4x8xf32>
    %16 = tpu.transpose %11, [1, 0, 2] : vector<8x4x8xf32> -> vector<4x8x8xf32>
    %17 = arith.truncf %16 : vector<4x8x8xf32> to vector<4x8x8xbf16>
    %18 = tpu.transpose %13, [1, 0, 2] : vector<8x4x8xf32> -> vector<4x8x8xf32>
    %19 = arith.truncf %18 : vector<4x8x8xf32> to vector<4x8x8xbf16>
    %20 = tpu.transpose %15, [1, 0, 2] : vector<8x4x8xf32> -> vector<4x8x8xf32>
    %21 = arith.truncf %20 : vector<4x8x8xf32> to vector<4x8x8xbf16>
    "tpu.trace_start"() <{level = 10 : i32, message = "hqd,hkd->hqk"}> : () -> ()
    %cst_7 = arith.constant dense<0.000000e+00> : vector<4x8x8xf32>
    %22 = tpu.matmul %17, %19, %cst_7 {dimension_numbers = #tpu.dot_dimension_numbers<[2], [2], [1], [1], [0, 0, 0, 1, 1, 1], [0], [0]>} : vector<4x8x8xbf16>, vector<4x8x8xbf16>, vector<4x8x8xf32> -> vector<4x8x8xf32>
    "tpu.trace_stop"() : () -> ()
    %cst_8 = arith.constant dense<0xFF800000> : vector<4x8xf32>
    %23 = vector.multi_reduction <maximumf>, %22, %cst_8 [2] : vector<4x8x8xf32> to vector<4x8xf32>
    %24 = vector.shape_cast %23 : vector<4x8xf32> to vector<4x8x1xf32>
    %25 = vector.broadcast %24 : vector<4x8x1xf32> to vector<4x8x8xf32>
    %26 = arith.subf %22, %25 : vector<4x8x8xf32>
    %27 = math.exp %26 : vector<4x8x8xf32>
    %cst_9 = arith.constant dense<0.000000e+00> : vector<4x8xf32>
    %28 = vector.multi_reduction <add>, %27, %cst_9 [2] : vector<4x8x8xf32> to vector<4x8xf32>
    %29 = vector.shape_cast %28 : vector<4x8xf32> to vector<4x8x1xf32>
    %30 = tpu.reciprocal %29 {approx = true} : vector<4x8x1xf32> -> vector<4x8x1xf32>
    %31 = vector.broadcast %30 : vector<4x8x1xf32> to vector<4x8x8xf32>
    %32 = arith.mulf %27, %31 : vector<4x8x8xf32>
    %33 = arith.truncf %32 : vector<4x8x8xf32> to vector<4x8x8xbf16>
    "tpu.trace_start"() <{level = 10 : i32, message = "hqk,hkd->hqd"}> : () -> ()
    %cst_10 = arith.constant dense<0.000000e+00> : vector<4x8x8xf32>
    %34 = tpu.matmul %33, %21, %cst_10 {dimension_numbers = #tpu.dot_dimension_numbers<[2], [1], [1], [2], [0, 0, 0, 1, 1, 2], [0], [0]>} : vector<4x8x8xbf16>, vector<4x8x8xbf16>, vector<4x8x8xf32> -> vector<4x8x8xf32>
    "tpu.trace_stop"() : () -> ()
    %35 = tpu.transpose %34, [1, 0, 2] : vector<4x8x8xf32> -> vector<8x4x8xf32>
    %36 = vector.shape_cast %35 : vector<8x4x8xf32> to vector<8x32xf32>
    %37 = arith.truncf %36 : vector<8x32xf32> to vector<8x32xbf16>
    %c0_11 = arith.constant 0 : index
    %c0_12 = arith.constant 0 : index
    %38 = vector.load %arg4[%c0_11, %c0_12] : memref<32x32xbf16, #tpu.memory_space<vmem>>, vector<32x32xbf16>
    %cst_13 = arith.constant dense<0.000000e+00> : vector<8x32xf32>
    %39 = tpu.matmul %37, %38, %cst_13 {dimension_numbers = #tpu.dot_dimension_numbers<[1], [0], [0], [1], [0, 0, 1, 1], [], []>} : vector<8x32xbf16>, vector<32x32xbf16>, vector<8x32xf32> -> vector<8x32xf32>
    %c0_14 = arith.constant 0 : index
    %c0_15 = arith.constant 0 : index
    %40 = vector.load %arg5[%c0_14, %c0_15] : memref<1x32xf32, #tpu.memory_space<vmem>>, vector<1x32xf32>
    %41 = vector.broadcast %40 : vector<1x32xf32> to vector<8x32xf32>
    %42 = arith.addf %39, %41 : vector<8x32xf32>
    %43 = arith.addf %1, %42 : vector<8x32xf32>
    %cst_16 = arith.constant dense<0.000000e+00> : vector<8xf32>
    %44 = vector.multi_reduction <add>, %43, %cst_16 [1] : vector<8x32xf32> to vector<8xf32>
    %45 = vector.shape_cast %44 : vector<8xf32> to vector<8x1xf32>
    %cst_17 = arith.constant 3.200000e+01 : f32
    %46 = vector.broadcast %cst_17 : f32 to vector<8x1xf32>
    %47 = arith.divf %45, %46 : vector<8x1xf32>
    %48 = vector.broadcast %47 : vector<8x1xf32> to vector<8x32xf32>
    %49 = arith.subf %43, %48 : vector<8x32xf32>
    %50 = arith.mulf %49, %49 : vector<8x32xf32>
    %cst_18 = arith.constant dense<0.000000e+00> : vector<8xf32>
    %51 = vector.multi_reduction <add>, %50, %cst_18 [1] : vector<8x32xf32> to vector<8xf32>
    %52 = vector.shape_cast %51 : vector<8xf32> to vector<8x1xf32>
    %cst_19 = arith.constant 3.200000e+01 : f32
    %53 = vector.broadcast %cst_19 : f32 to vector<8x1xf32>
    %54 = arith.divf %52, %53 : vector<8x1xf32>
    %55 = vector.broadcast %47 : vector<8x1xf32> to vector<8x32xf32>
    %56 = arith.subf %43, %55 : vector<8x32xf32>
    %cst_20 = arith.constant 9.99999974E-6 : f32
    %57 = vector.broadcast %cst_20 : f32 to vector<8x1xf32>
    %58 = arith.addf %54, %57 : vector<8x1xf32>
    %59 = math.rsqrt %58 : vector<8x1xf32>
    %60 = vector.broadcast %59 : vector<8x1xf32> to vector<8x32xf32>
    %61 = arith.mulf %56, %60 : vector<8x32xf32>
    %c0_21 = arith.constant 0 : index
    %c0_22 = arith.constant 0 : index
    %62 = vector.load %arg6[%c0_21, %c0_22] : memref<1x32xf32, #tpu.memory_space<vmem>>, vector<1x32xf32>
    %63 = vector.broadcast %62 : vector<1x32xf32> to vector<8x32xf32>
    %64 = arith.mulf %61, %63 : vector<8x32xf32>
    %c0_23 = arith.constant 0 : index
    %c0_24 = arith.constant 0 : index
    %65 = vector.load %arg7[%c0_23, %c0_24] : memref<1x32xf32, #tpu.memory_space<vmem>>, vector<1x32xf32>
    %66 = vector.broadcast %65 : vector<1x32xf32> to vector<8x32xf32>
    %67 = arith.addf %64, %66 : vector<8x32xf32>
    %68 = arith.truncf %67 : vector<8x32xf32> to vector<8x32xbf16>
    %c0_25 = arith.constant 0 : index
    %c0_26 = arith.constant 0 : index
    %69 = vector.load %arg8[%c0_25, %c0_26] : memref<32x64xbf16, #tpu.memory_space<vmem>>, vector<32x64xbf16>
    %cst_27 = arith.constant dense<0.000000e+00> : vector<8x64xf32>
    %70 = tpu.matmul %68, %69, %cst_27 {dimension_numbers = #tpu.dot_dimension_numbers<[1], [0], [0], [1], [0, 0, 1, 1], [], []>} : vector<8x32xbf16>, vector<32x64xbf16>, vector<8x64xf32> -> vector<8x64xf32>
    %c0_28 = arith.constant 0 : index
    %c0_29 = arith.constant 0 : index
    %71 = vector.load %arg9[%c0_28, %c0_29] : memref<1x64xf32, #tpu.memory_space<vmem>>, vector<1x64xf32>
    %72 = vector.broadcast %71 : vector<1x64xf32> to vector<8x64xf32>
    %73 = arith.addf %70, %72 : vector<8x64xf32>
    %cst_30 = arith.constant 0.000000e+00 : f32
    %74 = vector.broadcast %cst_30 : f32 to vector<8x64xf32>
    %75 = arith.maximumf %73, %74 : vector<8x64xf32>
    %76 = arith.truncf %75 : vector<8x64xf32> to vector<8x64xbf16>
    %c0_31 = arith.constant 0 : index
    %c0_32 = arith.constant 0 : index
    %77 = vector.load %arg10[%c0_31, %c0_32] : memref<64x32xbf16, #tpu.memory_space<vmem>>, vector<64x32xbf16>
    %cst_33 = arith.constant dense<0.000000e+00> : vector<8x32xf32>
    %78 = tpu.matmul %76, %77, %cst_33 {dimension_numbers = #tpu.dot_dimension_numbers<[1], [0], [0], [1], [0, 0, 1, 1], [], []>} : vector<8x64xbf16>, vector<64x32xbf16>, vector<8x32xf32> -> vector<8x32xf32>
    %c0_34 = arith.constant 0 : index
    %c0_35 = arith.constant 0 : index
    %79 = vector.load %arg11[%c0_34, %c0_35] : memref<1x32xf32, #tpu.memory_space<vmem>>, vector<1x32xf32>
    %80 = vector.broadcast %79 : vector<1x32xf32> to vector<8x32xf32>
    %81 = arith.addf %78, %80 : vector<8x32xf32>
    %82 = arith.addf %67, %81 : vector<8x32xf32>
    %cst_36 = arith.constant dense<0.000000e+00> : vector<8xf32>
    %83 = vector.multi_reduction <add>, %82, %cst_36 [1] : vector<8x32xf32> to vector<8xf32>
    %84 = vector.shape_cast %83 : vector<8xf32> to vector<8x1xf32>
    %cst_37 = arith.constant 3.200000e+01 : f32
    %85 = vector.broadcast %cst_37 : f32 to vector<8x1xf32>
    %86 = arith.divf %84, %85 : vector<8x1xf32>
    %87 = vector.broadcast %86 : vector<8x1xf32> to vector<8x32xf32>
    %88 = arith.subf %82, %87 : vector<8x32xf32>
    %89 = arith.mulf %88, %88 : vector<8x32xf32>
    %cst_38 = arith.constant dense<0.000000e+00> : vector<8xf32>
    %90 = vector.multi_reduction <add>, %89, %cst_38 [1] : vector<8x32xf32> to vector<8xf32>
    %91 = vector.shape_cast %90 : vector<8xf32> to vector<8x1xf32>
    %cst_39 = arith.constant 3.200000e+01 : f32
    %92 = vector.broadcast %cst_39 : f32 to vector<8x1xf32>
    %93 = arith.divf %91, %92 : vector<8x1xf32>
    %94 = vector.broadcast %86 : vector<8x1xf32> to vector<8x32xf32>
    %95 = arith.subf %82, %94 : vector<8x32xf32>
    %cst_40 = arith.constant 9.99999974E-6 : f32
    %96 = vector.broadcast %cst_40 : f32 to vector<8x1xf32>
    %97 = arith.addf %93, %96 : vector<8x1xf32>
    %98 = math.rsqrt %97 : vector<8x1xf32>
    %99 = vector.broadcast %98 : vector<8x1xf32> to vector<8x32xf32>
    %100 = arith.mulf %95, %99 : vector<8x32xf32>
    %c0_41 = arith.constant 0 : index
    %c0_42 = arith.constant 0 : index
    %101 = vector.load %arg12[%c0_41, %c0_42] : memref<1x32xf32, #tpu.memory_space<vmem>>, vector<1x32xf32>
    %102 = vector.broadcast %101 : vector<1x32xf32> to vector<8x32xf32>
    %103 = arith.mulf %100, %102 : vector<8x32xf32>
    %c0_43 = arith.constant 0 : index
    %c0_44 = arith.constant 0 : index
    %104 = vector.load %arg13[%c0_43, %c0_44] : memref<1x32xf32, #tpu.memory_space<vmem>>, vector<1x32xf32>
    %105 = vector.broadcast %104 : vector<1x32xf32> to vector<8x32xf32>
    %106 = arith.addf %103, %105 : vector<8x32xf32>
    %c0_45 = arith.constant 0 : index
    %c0_46 = arith.constant 0 : index
    %c0_47 = arith.constant 0 : index
    %107 = vector.load %arg14[%c0_45, %c0_46, %c0_47] : memref<1x8x32xf32, #tpu.memory_space<vmem>>, vector<1x8x32xf32>
    %108 = vector.shape_cast %107 : vector<1x8x32xf32> to vector<8x32xf32>
    %109 = vector.shape_cast %106 : vector<8x32xf32> to vector<1x8x32xf32>
    tpu.vector_store %arg14[%c0_45, %c0_46, %c0_47], %109 {strides = array<i32>} : memref<1x8x32xf32, #tpu.memory_space<vmem>>, vector<1x8x32xf32>,
    return
  }
  func.func @transform_0(%arg0: i32) -> (i32, i32, i32) {
    %c0_i32 = arith.constant 0 : i32
    %c0_i32_0 = arith.constant 0 : i32
    %c0_i32_1 = arith.constant 0 : i32
    return %arg0, %c0_i32, %c0_i32_0 : i32, i32, i32
  }
  func.func @transform_1(%arg0: i32) -> (i32, i32) {
    %c0_i32 = arith.constant 0 : i32
    %c0_i32_0 = arith.constant 0 : i32
    %c0_i32_1 = arith.constant 0 : i32
    return %c0_i32, %c0_i32_0 : i32, i32
  }
  func.func @transform_2(%arg0: i32) -> (i32, i32) {
    %c0_i32 = arith.constant 0 : i32
    %c0_i32_0 = arith.constant 0 : i32
    %c0_i32_1 = arith.constant 0 : i32
    return %c0_i32, %c0_i32_0 : i32, i32
  }
  func.func @transform_3(%arg0: i32) -> (i32, i32) {
    %c0_i32 = arith.constant 0 : i32
    %c0_i32_0 = arith.constant 0 : i32
    %c0_i32_1 = arith.constant 0 : i32
    return %c0_i32, %c0_i32_0 : i32, i32
  }
  func.func @transform_4(%arg0: i32) -> (i32, i32) {
    %c0_i32 = arith.constant 0 : i32
    %c0_i32_0 = arith.constant 0 : i32
    %c0_i32_1 = arith.constant 0 : i32
    return %c0_i32, %c0_i32_0 : i32, i32
  }
  func.func @transform_5(%arg0: i32) -> (i32, i32) {
    %c0_i32 = arith.constant 0 : i32
    %c0_i32_0 = arith.constant 0 : i32
    %c0_i32_1 = arith.constant 0 : i32
    return %c0_i32, %c0_i32_0 : i32, i32
  }
  func.func @transform_6(%arg0: i32) -> (i32, i32) {
    %c0_i32 = arith.constant 0 : i32
    %c0_i32_0 = arith.constant 0 : i32
    %c0_i32_1 = arith.constant 0 : i32
    return %c0_i32, %c0_i32_0 : i32, i32
  }
  func.func @transform_7(%arg0: i32) -> (i32, i32) {
    %c0_i32 = arith.constant 0 : i32
    %c0_i32_0 = arith.constant 0 : i32
    %c0_i32_1 = arith.constant 0 : i32
    return %c0_i32, %c0_i32_0 : i32, i32
  }
  func.func @transform_8(%arg0: i32) -> (i32, i32) {
    %c0_i32 = arith.constant 0 : i32
    %c0_i32_0 = arith.constant 0 : i32
    %c0_i32_1 = arith.constant 0 : i32
    return %c0_i32, %c0_i32_0 : i32, i32
  }
  func.func @transform_9(%arg0: i32) -> (i32, i32) {
    %c0_i32 = arith.constant 0 : i32
    %c0_i32_0 = arith.constant 0 : i32
    %c0_i32_1 = arith.constant 0 : i32
    return %c0_i32, %c0_i32_0 : i32, i32
  }
  func.func @transform_10(%arg0: i32) -> (i32, i32) {
    %c0_i32 = arith.constant 0 : i32
    %c0_i32_0 = arith.constant 0 : i32
    %c0_i32_1 = arith.constant 0 : i32
    return %c0_i32, %c0_i32_0 : i32, i32
  }
  func.func @transform_11(%arg0: i32) -> (i32, i32) {
    %c0_i32 = arith.constant 0 : i32
    %c0_i32_0 = arith.constant 0 : i32
    %c0_i32_1 = arith.constant 0 : i32
    return %c0_i32, %c0_i32_0 : i32, i32
  }
  func.func @transform_12(%arg0: i32) -> (i32, i32) {
    %c0_i32 = arith.constant 0 : i32
    %c0_i32_0 = arith.constant 0 : i32
    %c0_i32_1 = arith.constant 0 : i32
    return %c0_i32, %c0_i32_0 : i32, i32
  }
  func.func @transform_13(%arg0: i32) -> (i32, i32, i32) {
    %c0_i32 = arith.constant 0 : i32
    %c0_i32_0 = arith.constant 0 : i32
    %c0_i32_1 = arith.constant 0 : i32
    return %arg0, %c0_i32, %c0_i32_0 : i32, i32, i32
  }
}

</mosaic_0001>

<bundles_post_ra>
// kernel: tpu_custom_call.1
= control target key start
LH: loop header
LB: loop body
LE: loop exit
PB: predicated region body
PF: predicated region fallthrough
CT: control target
= control target key end

     0   :  { %s2235_s0 = inlined_call_operand.vmem [shape: f32[2,8,32], index: 0, kind: input, shape index: {}]   ;;  %s2236_s1 = inlined_call_operand.vmem [shape: bf16[32,96], index: 1, kind: input, shape index: {}]   ;;  %s2237_s2 = inlined_call_operand.vmem [shape: f32[1,96], index: 2, kind: input, shape index: {}]   ;;  %s2238_s3 = inlined_call_operand.vmem [shape: bf16[32,32], index: 3, kind: input, shape index: {}]   ;;  %s2239_s4 = inlined_call_operand.vmem [shape: f32[1,32], index: 4, kind: input, shape index: {}]   ;;  %s2240_s5 = inlined_call_operand.vmem [shape: f32[1,32], index: 5, kind: input, shape index: {}]   ;;  %s2241_s6 = inlined_call_operand.vmem [shape: f32[1,32], index: 6, kind: input, shape index: {}]   ;;  %s2242_s7 = inlined_call_operand.hbm [shape: bf16[32,64], index: 7, kind: input, shape index: {}]   ;;  %s2243_s8 = inlined_call_operand.vmem [shape: f32[1,64], index: 8, kind: input, shape index: {}]   ;;  %s2244_s9 = inlined_call_operand.vmem [shape: bf16[64,32], index: 9, kind: input, shape index: {}]   ;;  %s2245_s10 = inlined_call_operand.vmem [shape: f32[1,32], index: 10, kind: input, shape index: {}]   ;;  %s2246_s11 = inlined_call_operand.vmem [shape: f32[1,32], index: 11, kind: input, shape index: {}]   ;;  %s2247_s12 = inlined_call_operand.vmem [shape: f32[1,32], index: 12, kind: input, shape index: {}]   ;;  %s2248_s13 = inlined_call_operand.hbm [shape: f32[2,8,32], index: 13, kind: output, shape index: {}]  }
   0x1   :  { %2250 = sst [smem:[#allocation10_spill]] %s2235_s0 }
   0x2   :  { %2251 = sst [smem:[#allocation11_spill]] %s2242_s7 }
   0x3   :  { %18 = vsyncpa [#allocation3], 0 }
   0x4   :  { %19 = vsyncpa [#allocation4], 0 }
   0x5   :  { %21 = vsyncpa [#allocation4 + $0x1], 0  ;;  %s1866_s25 = smov 0   ;;  %s1868_s26 = smov 0  }
   0x6   :  { %s1870_s27 = smov 0   ;;  %s1872_s28 = smov 0  }
   0x7 LB: > { %2252 = sst [smem:[#allocation8_spill]] %s1776_s27  ;;  %s1887_s29 = sadd.s32 4294967295, %s1780_s28   ;;  %s1780_s28 = sphi %s1872_s28, %s2262_s28   ;;  %s1776_s27 = sphi %s1870_s27, %s2259_s27   ;;  %s1772_s26 = sphi %s1868_s26, %s2261_s26   ;;  %s1768_s25 = sphi %s1866_s25, %s2260_s25  }
   0x8   : > { %s1497_s30 = sadd.s32 4294967294, %s1780_s28   ;;  %s1891_s14 = sadd.s32 1, %s1780_s28  }
   0x9   : > { %s312_s15 = sadd.s32 1, %s1776_s27  ;;  %s309_s16 = ssub.s32 %s1780_s28, %s1891_s14 }
   0xa   : > { %p322_p0 = scmp.ne.s32.totalorder %s1776_s27, %s1772_s26  ;;  %p310_p1 = scmp.eq.s32.totalorder %s309_s16, 0 }
   0xb   : > { %p323_p2 = scmp.eq.s32.totalorder %s1887_s29, 1  ;;  %p328_p3 = scmp.ne.s32.totalorder %s1772_s26, %s1768_s25 }
   0xc   : > { %p329_p4 = scmp.eq.s32.totalorder %s1497_s30, 1  ;;  %p1498_p7 = scmp.ge.s32.totalorder %s1780_s28, 1 }
   0xd   : > { %s1902_s17 = scalar_select %p310_p1, %s1776_s27, %s312_s15  }
   0xe   : > { %p1904_p5 = por %p323_p2, %p322_p0  ;;  %p1908_p6 = por %p329_p4, %p328_p3 }
   0xf   : > { %2253 = sst [smem:[#allocation9_spill]] %s1902_s17  ;;  %p336_p8 = scmp.lt.s32.totalorder %s1780_s28, 3 }
  0x10   : > { %p1585_p9 = scmp.eq.s32.totalorder %s1887_s29, 0  ;;  %s2256_s7 = sld [smem:[#allocation11_spill]] }
  0x11   : > { %p337_p10 = pnand %p1498_p7, %p336_p8  ;;  %s1782_s23 = smov [#allocation2]  }
  0x12   : > { %s367_s24 = sshll.u32 %s1782_s23, 4  ;;  %s1783_s30 = smov 64   ;;  %s368_s24 = int_to_ptr.vmem [resolvable:$true] %s367_s24 }
  0x13   : > { %p1577_p11 = pneg %p337_p10  ;;  %s1784_s15 = smov 4  }
  0x14   : > { %405 = sbr.rel (%p337_p10) target bundleno = 2055 (0x807), region = 72 }
  0x15   : > { %p1578_p12 = pnand %p1585_p9, %p1577_p11 }
  0x16   : > { %s365_s22 = sshll.u32 %s2256_s7, 4  ;;  %s366_s22 = int_to_ptr.hbm [resolvable:$true] %s365_s22 }
  0x17   : > { %1580 = dma.hbm_to_vmem [thread:$0]  (!%p1578_p12), %s366_s22, 256, %s368_s24, [#allocation3], %s1783_s30, %s1783_s30, %s1784_s15  }
  0x19   : > { %1759 = dma.done.wait (%p1585_p9), [#allocation3], 256  }
  0x1a   : > { %1761 = vsyncadd (%p1585_p9), [#allocation3], 4294967040  ;;  %p449_p13 = scmp.lt.s32.totalorder %s1887_s29, 1  ;;  %s2257_s0 = sld [smem:[#allocation10_spill]]  ;;  %v1562_v0 = vld [vmem:[%s2236_s1 + $0x8] sm:$0xff]  ;;  %v1561_v1 = vld [vmem:[%s2236_s1] sm:$0xff] }
  0x1b   : > { %486 = vmatpush.bf16.msra.mxu0 %v1562_v0  ;;  %vm476_vm0 = vcmask 261120   ;;  %v1654_v4 = vld [vmem:[%s2237_s2] ss:$0 sm:$0xff]  ;;  %s1785_s27 = smov 104   ;;  %s1786_s17 = smov 120   ;;  %vm505_vm1 = vcmask 1047556  }
  0x1c   : > { %s450_s16 = scalar_select %p449_p13, %s1887_s29, 1  ;;  %v1789_v15 = vmov 1983009808   ;;  %v1790_v23 = vmov 1934713408   ;;  %vm878_vm2 = vcmask 64512  }
  0x1d   : > { %v510_v16 = vunpack.c.l.s4 %v1789_v15  ;;  %v534_v24 = vunpack.c.l.s4 %v1790_v23  ;;  %vm1006_vm3 = vcmask 1043456   ;;  %s1792_s21 = smov 16   ;;  %s1793_s23 = smov 8   ;;  %vm1203_vm4 = vcmask 130048  }
  0x1e   : > { %s1504_s20 = sshll.u32 %s450_s16, 3  ;;  %s1788_s16 = smov 96   ;;  %vm1205_vm5 = vcmask 195584   ;;  %vm1359_vm10 = vcmask 523264  }
  0x1f   : > { %487 = vmatpush.bf16.msra.mxu0 %v1561_v1  ;;  %v1949_v20 = vunpack.c.0.s8 %v510_v16  ;;  %v1958_v40 = vunpack.c.0.s8 %v534_v24  ;;  %s1794_s22 = smov 24   ;;  %s446_s24 = sand.u32 1, %s1772_s26  }
  0x20   : > { %s452_s7 = scalar_lea.vmem %s2257_s0, %s1504_s20  ;;  %s1791_s20 = smov 64  }
  0x21   : > { %v1935_v2 = vld [vmem:[%s452_s7] sm:$0xff]  ;;  %s1787_s7 = smov 112   ;;  %s1503_s30 = sshll.u32 %s446_s24, 3 }
  0x22   : > { %v455_v3 = vpack.c.bf16 %v1935_v2, %v1935_v2  ;;  %s1558_s15 = sshll.u32 %s1887_s29, 3 }
  0x24   : > { %1513 = vmatmul.msk.bf16.vlgmr.msra.gmra.mxu0 %vm476_vm0, %v455_v3 }
  0xa1   : > { %v489_v5 = vpop.f32.mrf.mxu0 }
  0xa2   : > { %v490_v6 = vadd.f32 %v1654_v4, %v489_v5 }
  0xa4   : > { %566 = vrot.lane.b32.xlu1 %v490_v6, %s1785_s27  ;;  %562 = vrot.lane.b32.xlu0 %v490_v6, %s1786_s17  ;;  %v493_v8 = vmul.f32 0.35355338, %v490_v6 }
  0xa6   : > { %v507_v22 = vrot.slane %v493_v8, 4 }
  0xa9   : > { %v491_v7 = vpop.f32.mrf.mxu0 }
  0xac   : > { %564 = vrot.lane.b32.xlu0 %v490_v6, %s1787_s7 }
  0xb4   : > { %498 = vrot.lane.b32.xlu0 %v493_v8, %s1787_s7 }
 0x116   : > { %v563_v9 = vpop.permute.xlu0 %562  ;;  %v567_v11 = vpop.permute.xlu1 %566 }
 0x117   : > { %v1943_v10 = vpack.i.bf16 %v563_v9, %v490_v6 }
 0x119   : > { %1635 = vrot.lane.b32.xlu1 %v1943_v10, %s1788_s16 }
 0x11e   : > { %v565_v12 = vpop.permute.xlu0 %564 }
 0x11f   : > { %v1946_v13 = vpack.i.bf16 %v567_v11, %v565_v12 }
 0x121   : > { %1640 = vrot.lane.b32.xlu2 %v1946_v13, %s1788_s16  ;;  %501 = vrot.lane.b32.xlu1 %v493_v8, %s1785_s27  ;;  %s1411_s27 = scalar_lea.sflag [#allocation4], %s446_s24 }
 0x126   : > { %v499_v17 = vpop.permute.xlu0 %498 }
 0x127   : > { %v504_v21 = vrot.slane %v499_v17, 4  ;;  %v508_v30 = vsel %vm505_vm1, %v499_v17, %v507_v22 }
 0x128   : > { %v516_v39 = vperm.slane %v508_v30, %v1949_v20 }
 0x129   : > { %495 = vrot.lane.b32.xlu2 %v493_v8, %s1786_s17  ;;  %v506_v35 = vsel %vm505_vm1, %v504_v21, %v493_v8 }
 0x12a   : > { %v512_v47 = vperm.slane %v506_v35, %v1949_v20  ;;  %v543_v58 = vrot.slane %v516_v39, 4 }
 0x12c   : > { %v531_v3 = vrot.slane %v512_v47, 4 }
 0x17b   : > { %v1641_v14 = vpop.permute.xlu2 %1640 }
 0x17c   : > { %v1643_v18 = vunpack.i.h.bf16 %v1641_v14  ;;  %v1642_v19 = vunpack.i.l.bf16 %v1641_v14 }
 0x17e   : > { %v592_v26 = vrot.slane %v1643_v18, 4  ;;  %v580_v27 = vrot.slane %v1642_v19, 4 }
 0x183   : > { %v496_v36 = vpop.permute.xlu2 %495 }
 0x184   : > { %v519_v48 = vrot.slane %v496_v36, 4 }
 0x18b   : > { %v1636_v25 = vpop.permute.xlu1 %1635 }
 0x18c   : > { %v1638_v28 = vunpack.i.h.bf16 %v1636_v25  ;;  %v1637_v29 = vunpack.i.l.bf16 %v1636_v25 }
 0x18e   : > { %v594_v31 = vrot.slane %v1638_v28, 4  ;;  %v581_v32 = vsel %vm505_vm1, %v580_v27, %v1637_v29  ;;  %v582_v33 = vrot.slane %v1637_v29, 4  ;;  %v593_v34 = vsel %vm505_vm1, %v592_v26, %v1638_v28 }
 0x18f   : > { %v587_v37 = vperm.slane %v581_v32, %v1949_v20  ;;  %v599_v38 = vperm.slane %v593_v34, %v1949_v20 }
 0x190   : > { %v583_v41 = vsel %vm505_vm1, %v1642_v19, %v582_v33  ;;  %v595_v42 = vsel %vm505_vm1, %v1643_v18, %v594_v31 }
 0x191   : > { %v591_v43 = vperm.slane %v583_v41, %v1949_v20  ;;  %v603_v44 = vperm.slane %v595_v42, %v1949_v20  ;;  %v604_v45 = vrot.slane %v599_v38, 4  ;;  %v606_v46 = vrot.slane %v587_v37, 4 }
 0x193   : > { %v605_v49 = vsel %vm505_vm1, %v604_v45, %v587_v37  ;;  %v607_v50 = vsel %vm505_vm1, %v599_v38, %v606_v46  ;;  %v616_v51 = vrot.slane %v603_v44, 4  ;;  %v618_v52 = vrot.slane %v591_v43, 4  ;;  %v502_v53 = vpop.permute.xlu1 %501 }
 0x194   : > { %v611_v54 = vperm.slane %v605_v49, %v1958_v40  ;;  %v615_v55 = vperm.slane %v607_v50, %v1958_v40  ;;  %v517_v56 = vrot.slane %v502_v53, 4  ;;  %v520_v57 = vsel %vm505_vm1, %v502_v53, %v519_v48 }
 0x195   : > { %v617_v59 = vsel %vm505_vm1, %v616_v51, %v591_v43  ;;  %v619_v60 = vsel %vm505_vm1, %v603_v44, %v618_v52  ;;  %v528_v61 = vperm.slane %v520_v57, %v1949_v20 }
 0x196   : > { %v623_v62 = vperm.slane %v617_v59, %v1958_v40  ;;  %v627_v63 = vperm.slane %v619_v60, %v1958_v40  ;;  %v628_v0 = vrot.slane %v611_v54, 4  ;;  %v630_v1 = vrot.slane %v615_v55, 4 }
 0x197   : > { %v518_v4 = vsel %vm505_vm1, %v517_v56, %v496_v36  ;;  %v541_v5 = vrot.slane %v528_v61, 4  ;;  %v544_v6 = vsel %vm505_vm1, %v528_v61, %v543_v58 }
 0x198   : > { %v629_v7 = vsel %vm505_vm1, 0.0, %v628_v0  ;;  %v631_v8 = vsel %vm505_vm1, 0.0, %v630_v1  ;;  %v632_v9 = vrot.slane %v623_v62, 4  ;;  %v634_v11 = vrot.slane %v627_v63, 4 }
 0x199   : > { %v762_v12 = vsel %vm505_vm1, %v630_v1, %v611_v54  ;;  %v767_v14 = vrot.slane %v631_v8, 4  ;;  %v524_v15 = vperm.slane %v518_v4, %v1949_v20  ;;  %v542_v16 = vsel %vm505_vm1, %v541_v5, %v516_v39 }
 0x19a   : > { %v635_v17 = vsel %vm505_vm1, 0.0, %v634_v11  ;;  %v548_v18 = vperm.slane %v542_v16, %v1958_v40  ;;  %v552_v19 = vperm.slane %v544_v6, %v1958_v40  ;;  %v633_v21 = vsel %vm505_vm1, 0.0, %v632_v9 }
 0x19b   : > { %v778_v22 = vrot.slane %v635_v17, 4  ;;  %v529_v23 = vrot.slane %v524_v15, 4  ;;  %v532_v24 = vsel %vm505_vm1, %v524_v15, %v531_v3  ;;  %v766_v25 = vperm.slane %v762_v12, %v1949_v20 }
 0x19c   : > { %v540_v26 = vperm.slane %v532_v24, %v1958_v40  ;;  %v557_v27 = vrot.slane %v548_v18, 4  ;;  %v559_v28 = vrot.slane %v552_v19, 4  ;;  %v768_v29 = vsel %vm505_vm1, %v767_v14, %v629_v7 }
 0x19d   : > { %v530_v30 = vsel %vm505_vm1, %v529_v23, %v512_v47  ;;  %v772_v31 = vperm.slane %v768_v29, %v1949_v20  ;;  %v773_v32 = vsel %vm505_vm1, %v634_v11, %v623_v62  ;;  %v779_v33 = vsel %vm505_vm1, %v778_v22, %v633_v21 }
 0x19e   : > { %v536_v34 = vperm.slane %v530_v30, %v1958_v40  ;;  %v555_v35 = vrot.slane %v540_v26, 4  ;;  %v558_v36 = vsel %vm505_vm1, 0.0, %v557_v27  ;;  %v560_v37 = vsel %vm505_vm1, 0.0, %v559_v28 }
 0x19f   : > { %v715_v38 = vsel %vm505_vm1, %v559_v28, %v548_v18  ;;  %v720_v39 = vrot.slane %v560_v37, 4  ;;  %v777_v41 = vperm.slane %v773_v32, %v1949_v20  ;;  %v783_v42 = vperm.slane %v779_v33, %v1949_v20 }
 0x1a0   : > { %v553_v43 = vrot.slane %v536_v34, 4  ;;  %v556_v44 = vsel %vm505_vm1, 0.0, %v555_v35  ;;  %v704_v45 = vsel %vm505_vm1, %v555_v35, %v536_v34  ;;  %v719_v46 = vperm.slane %v715_v38, %v1949_v20 }
 0x1a1   : > { %v708_v47 = vperm.slane %v704_v45, %v1949_v20  ;;  %v709_v48 = vrot.slane %v556_v44, 4  ;;  %v721_v49 = vsel %vm505_vm1, %v720_v39, %v558_v36  ;;  %v786_v50 = vrot.slane %v766_v25, 4 }
 0x1a2   : > { %v554_v51 = vsel %vm505_vm1, 0.0, %v553_v43  ;;  %v725_v52 = vperm.slane %v721_v49, %v1949_v20  ;;  %v740_v53 = vrot.slane %v719_v46, 4  ;;  %v798_v54 = vrot.slane %v777_v41, 4 }
 0x1a3   : > { %v710_v55 = vsel %vm505_vm1, %v709_v48, %v554_v51  ;;  %v787_v56 = vsel %vm505_vm1, %v772_v31, %v786_v50  ;;  %v784_v57 = vrot.slane %v772_v31, 4  ;;  %v796_v58 = vrot.slane %v783_v42, 4 }
 0x1a4   : > { %v795_v59 = vperm.slane %v787_v56, %v1958_v40  ;;  %v799_v60 = vsel %vm505_vm1, %v783_v42, %v798_v54  ;;  %v714_v61 = vperm.slane %v710_v55, %v1949_v20  ;;  %v728_v62 = vrot.slane %v708_v47, 4 }
 0x1a5   : > { %v807_v63 = vperm.slane %v799_v60, %v1958_v40  ;;  %v785_v0 = vsel %vm505_vm1, %v784_v57, %v766_v25  ;;  %v797_v1 = vsel %vm505_vm1, %v796_v58, %v777_v41  ;;  %v741_v3 = vsel %vm505_vm1, %v725_v52, %v740_v53 }
 0x1a6   : > { %v814_v4 = vrot.slane %v795_v59, 4  ;;  %v791_v5 = vperm.slane %v785_v0, %v1958_v40  ;;  %v803_v6 = vperm.slane %v797_v1, %v1958_v40  ;;  %v729_v7 = vsel %vm505_vm1, %v714_v61, %v728_v62 }
 0x1a7   : > { %v812_v8 = vrot.slane %v807_v63, 4  ;;  %v737_v9 = vperm.slane %v729_v7, %v1958_v40  ;;  %v749_v11 = vperm.slane %v741_v3, %v1958_v40  ;;  %v726_v12 = vrot.slane %v714_v61, 4 }
 0x1a8   : > { %v815_v14 = vsel %vm505_vm1, %v807_v63, %v814_v4  ;;  %v810_v15 = vrot.slane %v791_v5, 4  ;;  %v808_v16 = vrot.slane %v803_v6, 4  ;;  %v738_v17 = vrot.slane %v725_v52, 4 }
 0x1a9   : > { %v819_v18 = vpack.c.bf16 %v815_v14, %v815_v14  ;;  %v813_v19 = vsel %vm505_vm1, %v812_v8, %v795_v59  ;;  %v756_v21 = vrot.slane %v737_v9, 4  ;;  %v727_v22 = vsel %vm505_vm1, %v726_v12, %v708_v47 }
 0x1aa   : > { %v811_v23 = vsel %vm505_vm1, %v803_v6, %v810_v15  ;;  %v818_v24 = vpack.c.bf16 %v813_v19, %v813_v19  ;;  %v809_v25 = vsel %vm505_vm1, %v808_v16, %v791_v5  ;;  %v733_v26 = vperm.slane %v727_v22, %v1958_v40 }
 0x1ab   : > { %v940_v27 = vsel %vm878_vm2, %v819_v18, 0  ;;  %v817_v28 = vpack.c.bf16 %v811_v23, %v811_v23  ;;  %v816_v29 = vpack.c.bf16 %v809_v25, %v809_v25  ;;  %v739_v31 = vsel %vm505_vm1, %v738_v17, %v719_v46 }
 0x1ac   : > { %949 = vmatpush.bf16.xpose.msrb.mxu0 %v940_v27  ;;  %v921_v30 = vsel %vm878_vm2, %v818_v24, 0  ;;  %v752_v32 = vrot.slane %v733_v26, 4  ;;  %v745_v35 = vperm.slane %v739_v31, %v1958_v40  ;;  %v754_v36 = vrot.slane %v749_v11, 4 }
 0x1ad   : > { %v902_v33 = vsel %vm878_vm2, %v817_v28, 0  ;;  %930 = vmatpush.bf16.xpose.msra.mxu3 %v921_v30  ;;  %v883_v34 = vsel %vm878_vm2, %v816_v29, 0  ;;  %v757_v37 = vsel %vm505_vm1, %v749_v11, %v756_v21 }
 0x1ae   : > { %911 = vmatpush.bf16.xpose.msra.mxu2 %v902_v33  ;;  %892 = vmatpush.bf16.xpose.msra.mxu1 %v883_v34  ;;  %v755_v38 = vsel %vm505_vm1, %v754_v36, %v737_v9  ;;  %v750_v39 = vrot.slane %v745_v35, 4  ;;  %v753_v41 = vsel %vm505_vm1, %v745_v35, %v752_v32  ;;  %v761_v42 = vpack.c.bf16 %v757_v37, %v757_v37 }
 0x1af   : > { %v760_v44 = vpack.c.bf16 %v755_v38, %v755_v38  ;;  %v759_v45 = vpack.c.bf16 %v753_v41, %v753_v41 }
 0x1b0   : > { %v751_v43 = vsel %vm505_vm1, %v750_v39, %v733_v26 }
 0x1b1   : > { %v758_v46 = vpack.c.bf16 %v751_v43, %v751_v43 }
 0x1b3   : > { %1517 = vmatmul.msk.bf16.vlgmr.msrb.gmra.mxu0 %vm878_vm2, %v761_v42 }
 0x1b4   : > { %1516 = vmatmul.msk.bf16.vlgmr.msra.gmra.mxu3 %vm878_vm2, %v760_v44 }
 0x1b5   : > { %1515 = vmatmul.msk.bf16.vlgmr.msra.gmra.mxu2 %vm878_vm2, %v759_v45  ;;  %1514 = vmatmul.msk.bf16.vlgmr.msra.gmra.mxu1 %vm878_vm2, %v758_v46 }
 0x230   : > { %v951_v47 = vpop.f32.mrf.mxu0 }
 0x231   : > { %v964_v48 = vsel %vm878_vm2, %v951_v47, -inf }
 0x232   : > { %965 = vmax.xlane.f32.xlu2 %v964_v48  ;;  %v894_v49 = vpop.f32.mrf.mxu1 }
 0x233   : > { %v955_v50 = vsel %vm878_vm2, %v894_v49, -inf }
 0x234   : > { %956 = vmax.xlane.f32.xlu1 %v955_v50 }
 0x237   : > { %v932_v51 = vpop.f32.mrf.mxu3 }
 0x238   : > { %v913_v52 = vpop.f32.mrf.mxu2  ;;  %v953_v53 = vpop.f32.mrf.mxu0  ;;  %v961_v54 = vsel %vm878_vm2, %v932_v51, -inf }
 0x239   : > { %v958_v55 = vsel %vm878_vm2, %v913_v52, -inf }
 0x23a   : > { %962 = vmax.xlane.f32.xlu2 %v961_v54  ;;  %959 = vmax.xlane.f32.xlu0 %v958_v55  ;;  %v896_v56 = vpop.f32.mrf.mxu1 }
 0x23f   : > { %v934_v57 = vpop.f32.mrf.mxu3 }
 0x240   : > { %v915_v58 = vpop.f32.mrf.mxu2 }
 0x24e   : > { %1650 = vrot.lane.b32.xlu0 %v1946_v13, %s1791_s20 }
 0x252   : > { %1645 = vrot.lane.b32.xlu2 %v1943_v10, %s1791_s20  ;;  %s1421_s20 = scalar_lea.hbm %s2248_s13, %s1558_s15 }
 0x253   : > { %s1425_s0 = sshll.u32 %s1421_s20, 4  ;;  %s1426_s0 = int_to_ptr.hbm [resolvable:$true] %s1425_s0 }
 0x254   : > { %s1728_s17 = sshra.s32 %s1426_s0, 4  ;;  %s1729_s17 = int_to_ptr.hbm [resolvable:$true] %s1728_s17 }
 0x255   : > { %s1730_s15 = scalar_lea.hbm %s1729_s17, 8  ;;  %p1735_p3 = scmp.lt.s32.totalorder %s1729_s17, %s2248_s13 }
 0x256   : > { %p1731_p0 = scmp.ne.s32.totalorder %s1729_s17, %s1730_s15 }
 0x258   : > { %p1732_p1 = pnand %p1731_p0, %p1904_p5 }
 0x25a   : > { %p1733_p2 = pneg %p1732_p1 }
 0x2a5   : > { %v966_v59 = vpop.xlane.xlu2 %965 }
 0x2a6   : > { %v970_v60 = vsub.f32 %v951_v47, %v966_v59 }
 0x2a7   : > { %v957_v13 = vpop.xlane.xlu1 %956 }
 0x2a8   : > { %v977_v61 = vmul.f32 1.442695, %v970_v60  ;;  %v967_v10 = vsub.f32 %v894_v49, %v957_v13 }
 0x2aa   : > { %1662 = vpow2.f32 %v977_v61  ;;  %v971_v11 = vmul.f32 1.442695, %v967_v10 }
 0x2ad   : > { %v963_v62 = vpop.xlane.xlu2 %962  ;;  %v960_v63 = vpop.xlane.xlu0 %959 }
 0x2ae   : > { %v969_v0 = vsub.f32 %v932_v51, %v963_v62  ;;  %v968_v4 = vsub.f32 %v913_v52, %v960_v63 }
 0x2b0   : > { %v2047_v1 = vpop.eup %1662  ;;  %v975_v3 = vmul.f32 1.442695, %v969_v0  ;;  %v973_v6 = vmul.f32 1.442695, %v968_v4 }
 0x2b1   : > { %v988_v5 = vsel %vm878_vm2, %v2047_v1, 0.0 }
 0x2b2   : > { %1664 = vpow2.f32 %v975_v3  ;;  %989 = vadd.xlane.f32.xlu0 %v988_v5 }
 0x2b3   : > { %1666 = vpow2.f32 %v973_v6 }
 0x2b4   : > { %1668 = vpow2.f32 %v971_v11 }
 0x2b5   : > { %v1646_v8 = vpop.permute.xlu2 %1645 }
 0x2b6   : > { %v1648_v12 = vunpack.i.h.bf16 %v1646_v8  ;;  %v1647_v14 = vunpack.i.l.bf16 %v1646_v8 }
 0x2b8   : > { %v2051_v7 = vpop.eup %1664  ;;  %v662_v16 = vrot.slane %v1648_v12, 4  ;;  %v650_v18 = vrot.slane %v1647_v14, 4 }
 0x2b9   : > { %v985_v9 = vsel %vm878_vm2, %v2051_v7, 0.0  ;;  %v2055_v15 = vpop.eup %1666 }
 0x2ba   : > { %986 = vadd.xlane.f32.xlu1 %v985_v9  ;;  %v982_v22 = vsel %vm878_vm2, %v2055_v15, 0.0  ;;  %v2065_v31 = vpop.eup %1668 }
 0x2bb   : > { %v979_v43 = vsel %vm878_vm2, %v2065_v31, 0.0 }
 0x2c0   : > { %v1651_v17 = vpop.permute.xlu0 %1650 }
 0x2c1   : > { %v1653_v19 = vunpack.i.h.bf16 %v1651_v17  ;;  %v1652_v21 = vunpack.i.l.bf16 %v1651_v17 }
 0x2c2   : > { %983 = vadd.xlane.f32.xlu1 %v982_v22 }
 0x2c3   : > { %v660_v23 = vrot.slane %v1653_v19, 4  ;;  %v663_v24 = vsel %vm505_vm1, %v1653_v19, %v662_v16  ;;  %v648_v25 = vrot.slane %v1652_v21, 4  ;;  %v651_v26 = vsel %vm505_vm1, %v1652_v21, %v650_v18 }
 0x2c4   : > { %v671_v27 = vperm.slane %v663_v24, %v1949_v20  ;;  %v659_v28 = vperm.slane %v651_v26, %v1949_v20 }
 0x2c5   : > { %v661_v29 = vsel %vm505_vm1, %v660_v23, %v1648_v12  ;;  %v649_v30 = vsel %vm505_vm1, %v648_v25, %v1647_v14 }
 0x2c6   : > { %v667_v32 = vperm.slane %v661_v29, %v1949_v20  ;;  %v684_v33 = vrot.slane %v671_v27, 4  ;;  %v655_v34 = vperm.slane %v649_v30, %v1949_v20  ;;  %v686_v35 = vrot.slane %v659_v28, 4 }
 0x2c8   : > { %v672_v36 = vrot.slane %v667_v32, 4  ;;  %v674_v37 = vrot.slane %v655_v34, 4  ;;  %v685_v38 = vsel %vm505_vm1, %v684_v33, %v659_v28  ;;  %v687_v39 = vsel %vm505_vm1, %v671_v27, %v686_v35 }
 0x2c9   : > { %v691_v41 = vperm.slane %v685_v38, %v1958_v40  ;;  %v695_v42 = vperm.slane %v687_v39, %v1958_v40 }
 0x2ca   : > { %v673_v44 = vsel %vm505_vm1, %v672_v36, %v655_v34  ;;  %v675_v45 = vsel %vm505_vm1, %v667_v32, %v674_v37  ;;  %980 = vadd.xlane.f32.xlu1 %v979_v43 }
 0x2cb   : > { %v679_v46 = vperm.slane %v673_v44, %v1958_v40  ;;  %v683_v47 = vperm.slane %v675_v45, %v1958_v40  ;;  %v700_v48 = vrot.slane %v691_v41, 4  ;;  %v702_v49 = vrot.slane %v695_v42, 4 }
 0x2cd   : > { %v696_v50 = vrot.slane %v679_v46, 4  ;;  %v698_v51 = vrot.slane %v683_v47, 4  ;;  %v703_v52 = vsel %vm505_vm1, 0.0, %v702_v49  ;;  %v831_v53 = vsel %vm505_vm1, %v702_v49, %v691_v41 }
 0x2ce   : > { %v836_v54 = vrot.slane %v703_v52, 4  ;;  %v701_v56 = vsel %vm505_vm1, 0.0, %v700_v48  ;;  %v835_v58 = vperm.slane %v831_v53, %v1949_v20 }
 0x2cf   : > { %v699_v55 = vsel %vm505_vm1, 0.0, %v698_v51  ;;  %v820_v57 = vsel %vm505_vm1, %v698_v51, %v679_v46  ;;  %v697_v62 = vsel %vm505_vm1, 0.0, %v696_v50 }
 0x2d0   : > { %v825_v59 = vrot.slane %v699_v55, 4  ;;  %v824_v60 = vperm.slane %v820_v57, %v1949_v20  ;;  %v837_v61 = vsel %vm505_vm1, %v836_v54, %v701_v56  ;;  %v856_v0 = vrot.slane %v835_v58, 4 }
 0x2d1   : > { %v841_v63 = vperm.slane %v837_v61, %v1949_v20 }
 0x2d2   : > { %v826_v3 = vsel %vm505_vm1, %v825_v59, %v697_v62  ;;  %v844_v4 = vrot.slane %v824_v60, 4 }
 0x2d3   : > { %v830_v5 = vperm.slane %v826_v3, %v1949_v20  ;;  %v857_v6 = vsel %vm505_vm1, %v841_v63, %v856_v0  ;;  %v854_v13 = vrot.slane %v841_v63, 4 }
 0x2d4   : > { %v865_v10 = vperm.slane %v857_v6, %v1958_v40 }
 0x2d5   : > { %v845_v8 = vsel %vm505_vm1, %v830_v5, %v844_v4  ;;  %v842_v9 = vrot.slane %v830_v5, 4  ;;  %v855_v11 = vsel %vm505_vm1, %v854_v13, %v835_v58 }
 0x2d6   : > { %v853_v12 = vperm.slane %v845_v8, %v1958_v40  ;;  %v870_v14 = vrot.slane %v865_v10, 4  ;;  %v861_v16 = vperm.slane %v855_v11, %v1958_v40 }
 0x2d7   : > { %v843_v17 = vsel %vm505_vm1, %v842_v9, %v824_v60 }
 0x2d8   : > { %v871_v18 = vsel %vm505_vm1, %v870_v14, %v853_v12  ;;  %v872_v19 = vrot.slane %v853_v12, 4  ;;  %v849_v21 = vperm.slane %v843_v17, %v1958_v40  ;;  %v866_v22 = vrot.slane %v861_v16, 4 }
 0x2d9   : > { %v876_v23 = vpack.c.bf16 %v871_v18, %v871_v18 }
 0x2da   : > { %v867_v24 = vsel %vm505_vm1, %v866_v22, %v849_v21  ;;  %v873_v25 = vsel %vm505_vm1, %v865_v10, %v872_v19  ;;  %v868_v26 = vrot.slane %v849_v21, 4 }
 0x2db   : > { %v1046_v27 = vsel %vm1006_vm3, %v876_v23, 0  ;;  %v874_v28 = vpack.c.bf16 %v867_v24, %v867_v24  ;;  %v877_v29 = vpack.c.bf16 %v873_v25, %v873_v25 }
 0x2dc   : > { %1055 = vmatpush.bf16.msrb.mxu3 %v1046_v27  ;;  %v869_v30 = vsel %vm505_vm1, %v861_v16, %v868_v26 }
 0x2dd   : > { %v1008_v32 = vsel %vm1006_vm3, %v874_v28, 0  ;;  %v1065_v33 = vsel %vm1006_vm3, %v877_v29, 0  ;;  %v875_v34 = vpack.c.bf16 %v869_v30, %v869_v30 }
 0x2de   : > { %1017 = vmatpush.bf16.msrb.mxu1 %v1008_v32  ;;  %1074 = vmatpush.bf16.msra.mxu0 %v1065_v33 }
 0x2df   : > { %v1027_v35 = vsel %vm1006_vm3, %v875_v34, 0 }
 0x2e0   : > { %1036 = vmatpush.bf16.msrb.mxu2 %v1027_v35 }
 0x325   : > { %v990_v36 = vpop.xlane.xlu0 %989 }
 0x326   : > { %1670 = vrcp.f32 %v990_v36 }
 0x32c   : > { %v1671_v37 = vpop.eup %1670 }
 0x32d   : > { %v998_v38 = vmul.f32 %v1671_v37, %v2047_v1  ;;  %v987_v39 = vpop.xlane.xlu1 %986 }
 0x32e   : > { %1672 = vrcp.f32 %v987_v39 }
 0x32f   : > { %v1002_v41 = vpack.c.bf16 %v998_v38, %v998_v38 }
 0x331   : > { %1521 = vmatmul.msk.bf16.vlgmr.msra.gmra.mxu0 %vm878_vm2, %v1002_v41 }
 0x334   : > { %v1673_v42 = vpop.eup %1672 }
 0x335   : > { %v997_v43 = vmul.f32 %v1673_v42, %v2051_v7  ;;  %v984_v44 = vpop.xlane.xlu1 %983 }
 0x336   : > { %1674 = vrcp.f32 %v984_v44 }
 0x337   : > { %v1001_v45 = vpack.c.bf16 %v997_v43, %v997_v43 }
 0x339   : > { %1520 = vmatmul.msk.bf16.vlgmr.msrb.gmra.mxu3 %vm878_vm2, %v1001_v45 }
 0x33c   : > { %v1675_v46 = vpop.eup %1674 }
 0x33d   : > { %v996_v47 = vmul.f32 %v1675_v46, %v2055_v15  ;;  %v981_v48 = vpop.xlane.xlu1 %980 }
 0x33e   : > { %1676 = vrcp.f32 %v981_v48 }
 0x33f   : > { %v1000_v49 = vpack.c.bf16 %v996_v47, %v996_v47 }
 0x341   : > { %1519 = vmatmul.msk.bf16.vlgmr.msrb.gmra.mxu2 %vm878_vm2, %v1000_v49 }
 0x344   : > { %v1677_v1 = vpop.eup %1676 }
 0x345   : > { %v995_v50 = vmul.f32 %v1677_v1, %v2065_v31 }
 0x347   : > { %v999_v51 = vpack.c.bf16 %v995_v50, %v995_v50 }
 0x349   : > { %1518 = vmatmul.msk.bf16.vlgmr.msrb.gmra.mxu1 %vm878_vm2, %v999_v51 }
 0x3ae   : > { %v1076_v7 = vpop.f32.mrf.mxu0 }
 0x3af   : > { %v1092_v54 = vrot.slane %v1076_v7, 4 }
 0x3b6   : > { %v1078_v52 = vpop.f32.mrf.mxu0 }
 0x3bc   : > { %v1057_v53 = vpop.f32.mrf.mxu3 }
 0x3bd   : > { %v1080_v57 = vrot.slane %v1057_v53, 4 }
 0x3c4   : > { %v1038_v55 = vpop.f32.mrf.mxu2  ;;  %v1059_v56 = vpop.f32.mrf.mxu3 }
 0x3c5   : > { %v1093_v15 = vsel %vm505_vm1, %v1092_v54, %v1038_v55  ;;  %v1094_v58 = vrot.slane %v1038_v55, 4 }
 0x3c6   : > { %v1099_v59 = vperm.slane %v1093_v15, %v1949_v20  ;;  %v1019_v60 = vpop.f32.mrf.mxu1 }
 0x3c7   : > { %v1095_v61 = vsel %vm505_vm1, %v1076_v7, %v1094_v58  ;;  %v1081_v31 = vsel %vm505_vm1, %v1080_v57, %v1019_v60  ;;  %v1082_v62 = vrot.slane %v1019_v60, 4  ;;  %v1563_v58 = vld [vmem:[%s2238_s3] sm:$0xff] }
 0x3c8   : > { %v1103_v63 = vperm.slane %v1095_v61, %v1949_v20  ;;  %v1104_v0 = vrot.slane %v1099_v59, 4  ;;  %v1087_v3 = vperm.slane %v1081_v31, %v1949_v20 }
 0x3c9   : > { %v1083_v4 = vsel %vm505_vm1, %v1057_v53, %v1082_v62 }
 0x3ca   : > { %v1116_v5 = vrot.slane %v1103_v63, 4  ;;  %v1091_v6 = vperm.slane %v1083_v4, %v1949_v20  ;;  %v1105_v13 = vsel %vm505_vm1, %v1104_v0, %v1087_v3  ;;  %v1106_v10 = vrot.slane %v1087_v3, 4  ;;  %v1655_v3 = vld [vmem:[%s2239_s4] ss:$0 sm:$0xff] }
 0x3cb   : > { %v1111_v8 = vperm.slane %v1105_v13, %v1958_v40 }
 0x3cc   : > { %v1107_v9 = vsel %vm505_vm1, %v1099_v59, %v1106_v10  ;;  %v1117_v11 = vsel %vm505_vm1, %v1116_v5, %v1091_v6  ;;  %v1118_v12 = vrot.slane %v1091_v6, 4  ;;  %v1040_v14 = vpop.f32.mrf.mxu2 }
 0x3cd   : > { %v1115_v16 = vperm.slane %v1107_v9, %v1958_v40  ;;  %v1123_v17 = vperm.slane %v1117_v11, %v1958_v40  ;;  %v1128_v22 = vrot.slane %v1111_v8, 4 }
 0x3ce   : > { %v1119_v18 = vsel %vm505_vm1, %v1103_v63, %v1118_v12  ;;  %v1021_v19 = vpop.f32.mrf.mxu1 }
 0x3cf   : > { %v1127_v21 = vperm.slane %v1119_v18, %v1958_v40  ;;  %v1130_v23 = vrot.slane %v1115_v16, 4  ;;  %v1132_v25 = vrot.slane %v1123_v17, 4  ;;  %v1129_v30 = vsel %vm505_vm1, 0.0, %v1128_v22 }
 0x3d1   : > { %v1131_v24 = vsel %vm505_vm1, 0.0, %v1130_v23  ;;  %v1134_v26 = vrot.slane %v1127_v21, 4  ;;  %v1136_v27 = vsel %vm505_vm1, %v1130_v23, %v1111_v8  ;;  %v1133_v37 = vsel %vm505_vm1, 0.0, %v1132_v25  ;;  %v1570_v25 = vld [vmem:[%s2244_s9 + $0x18] sm:$0xff] }
 0x3d2   : > { %v1141_v28 = vrot.slane %v1131_v24, 4  ;;  %v1140_v29 = vperm.slane %v1136_v27, %v1949_v20  ;;  %v1795_v8 = vmov 32.0   ;;  %v1565_v24 = vld [vmem:[#allocation2] sm:$0xff]  ;;  %1367 = vmatpush.bf16.msra.mxu3 %v1570_v25 }
 0x3d3   : > { %v1135_v32 = vsel %vm505_vm1, 0.0, %v1134_v26  ;;  %v1147_v33 = vsel %vm505_vm1, %v1134_v26, %v1123_v17  ;;  %1678 = vrcp.f32 %v1795_v8 }
 0x3d4   : > { %v1152_v34 = vrot.slane %v1135_v32, 4  ;;  %v1142_v35 = vsel %vm505_vm1, %v1141_v28, %v1129_v30  ;;  %v1151_v36 = vperm.slane %v1147_v33, %v1949_v20  ;;  %v1160_v39 = vrot.slane %v1140_v29, 4  ;;  %v1569_v28 = vld [vmem:[%s2244_s9 + $0x10] sm:$0xff] }
 0x3d5   : > { %v1146_v38 = vperm.slane %v1142_v35, %v1949_v20 }
 0x3d6   : > { %v1153_v41 = vsel %vm505_vm1, %v1152_v34, %v1133_v37  ;;  %v1172_v42 = vrot.slane %v1151_v36, 4  ;;  %1368 = vmatpush.bf16.msra.mxu3 %v1569_v28  ;;  %v1656_v37 = vld [vmem:[%s2240_s5] ss:$0 sm:$0xff] }
 0x3d7   : > { %v1157_v43 = vperm.slane %v1153_v41, %v1949_v20  ;;  %v1158_v44 = vrot.slane %v1146_v38, 4  ;;  %v1161_v45 = vsel %vm505_vm1, %v1146_v38, %v1160_v39  ;;  %v1657_v39 = vld [vmem:[%s2241_s6] ss:$0 sm:$0xff] }
 0x3d8   : > { %v1169_v51 = vperm.slane %v1161_v45, %v1958_v40  ;;  %v1568_v45 = vld [vmem:[%s2244_s9 + $0x8] sm:$0xff] }
 0x3d9   : > { %v1173_v46 = vsel %vm505_vm1, %v1157_v43, %v1172_v42  ;;  %v1159_v47 = vsel %vm505_vm1, %v1158_v44, %v1140_v29  ;;  %v1170_v48 = vrot.slane %v1157_v43, 4  ;;  %v1679_v9 = vpop.eup %1678 }
 0x3da   : > { %v1181_v49 = vperm.slane %v1173_v46, %v1958_v40  ;;  %v1165_v1 = vperm.slane %v1159_v47, %v1958_v40  ;;  %v1188_v57 = vrot.slane %v1169_v51, 4  ;;  %v1249_v11 = vmul.f32 32.0, %v1679_v9  ;;  %1369 = vmatpush.bf16.msra.mxu3 %v1568_v45  ;;  %v1567_v46 = vld [vmem:[%s2244_s9] sm:$0xff] }
 0x3db   : > { %v1171_v50 = vsel %vm505_vm1, %v1170_v48, %v1151_v36  ;;  %vm1253_vm6 = vweird.f32 %v1679_v9  ;;  %v1658_v47 = vld [vmem:[%s2243_s8] ss:$0 sm:$0xff] }
 0x3dc   : > { %v1186_v7 = vrot.slane %v1181_v49, 4  ;;  %v1177_v52 = vperm.slane %v1171_v50, %v1958_v40  ;;  %v1184_v20 = vrot.slane %v1165_v1, 4  ;;  %v1189_v15 = vsel %vm505_vm1, %v1181_v49, %v1188_v57  ;;  %v1564_v40 = vld [vmem:[%s2238_s3 + $0x8] sm:$0xff] }
 0x3dd   : > { %1237 = vmatpush.bf16.msra.mxu1 %v1564_v40  ;;  %v1250_v12 = vsub.f32 1.0, %v1249_v11 }
 0x3de   : > { %v1187_v53 = vsel %vm505_vm1, %v1186_v7, %v1169_v51  ;;  %v1182_v54 = vrot.slane %v1177_v52, 4  ;;  %v1185_v55 = vsel %vm505_vm1, %v1177_v52, %v1184_v20  ;;  %1370 = vmatpush.bf16.msra.mxu3 %v1567_v46  ;;  %v1659_v7 = vld [vmem:[%s2245_s10] ss:$0 sm:$0xff] }
 0x3df   : > { %1195 = vrot.lane.b32.xlu1 %v1187_v53, %s1792_s21  ;;  %1191 = vrot.lane.b32.xlu2 %v1185_v55, %s1793_s23  ;;  %v1251_v14 = vmul.f32 %v1679_v9, %v1250_v12 }
 0x3e0   : > { %v1183_v56 = vsel %vm505_vm1, %v1182_v54, %v1165_v1 }
 0x3e1   : > { %1238 = vmatpush.bf16.msra.mxu1 %v1563_v58  ;;  %v1252_v16 = vadd.f32 %v1679_v9, %v1251_v14 }
 0x3e3   : > { %v1254_v17 = vsel %vm1253_vm6, %v1679_v9, %v1252_v16 }
 0x3e7   : > { %1199 = vrot.lane.b32.xlu2 %v1189_v15, %s1794_s22  ;;  %s448_s22 = scalar_lea.vmem [#allocation5], %s1503_s30  ;;  %s1734_s30 = scalar_lea.hbm %s2248_s13, 16 }
 0x3e8   : > { %s1423_s29 = sshll.u32 %s448_s22, 4  ;;  %p1736_p4 = scmp.lt.s32.totalorder %s1734_s30, %s1730_s15  ;;  %s1424_s29 = int_to_ptr.vmem [resolvable:$true] %s1423_s29 }
 0x3ea   : > { %p1737_p7 = por %p1736_p4, %p1735_p3 }
 0x3ec   : > { %p1738_p8 = pnand %p1737_p7, %p1733_p2 }
 0x439   : > { %v1192_v59 = vpop.permute.xlu2 %1191 }
 0x43a   : > { %v1202_v60 = vsel %vm878_vm2, %v1183_v56, %v1192_v59 }
 0x441   : > { %v1200_v31 = vpop.permute.xlu2 %1199 }
 0x451   : > { %v1196_v61 = vpop.permute.xlu1 %1195 }
 0x452   : > { %v1204_v62 = vsel %vm1203_vm4, %v1202_v60, %v1196_v61 }
 0x453   : > { %v1206_v63 = vsel %vm1205_vm5, %v1204_v62, %v1200_v31 }
 0x454   : > { %v1207_v0 = vpack.c.bf16 %v1206_v63, %v1206_v63 }
 0x456   : > { %1530 = vmatmul.msk.bf16.vlgmr.msra.gmra.mxu1 %vm476_vm0, %v1207_v0 }
 0x4d3   : > { %v1240_v4 = vpop.f32.mrf.mxu1 }
 0x4d4   : > { %v1241_v5 = vadd.f32 %v1655_v3, %v1240_v4 }
 0x4d6   : > { %v1244_v6 = vadd.f32 %v1241_v5, %v1935_v2  ;;  %v1566_v2 = vld [vmem:[#allocation2 + $0x8] sm:$0xff]  ;;  %v1660_v5 = vld [vmem:[%s2246_s11] ss:$0 sm:$0xff] }
 0x4d7   : > { %1314 = vmatpush.bf16.msra.mxu2 %v1566_v2 }
 0x4d8   : > { %v1245_v13 = vsel %vm476_vm0, %v1244_v6, 0.0 }
 0x4d9   : > { %1246 = vadd.xlane.f32.xlu2 %v1245_v13 }
 0x4db   : > { %v1242_v10 = vpop.f32.mrf.mxu1  ;;  %1315 = vmatpush.bf16.msra.mxu2 %v1565_v24 }
 0x4dc   : > { %v1661_v10 = vld [vmem:[%s2247_s12] ss:$0 sm:$0xff] }
 0x54c   : > { %v1247_v18 = vpop.xlane.xlu2 %1246 }
 0x54d   : > { %v1255_v19 = vmul.f32 %v1254_v17, %v1247_v18 }
 0x54f   : > { %v1256_v21 = vsub.f32 %v1244_v6, %v1255_v19 }
 0x551   : > { %v1257_v22 = vmul.f32 %v1256_v21, %v1256_v21 }
 0x553   : > { %v1258_v23 = vsel %vm476_vm0, %v1257_v22, 0.0 }
 0x554   : > { %1259 = vadd.xlane.f32.xlu1 %v1258_v23 }
 0x5c7   : > { %v1260_v26 = vpop.xlane.xlu1 %1259 }
 0x5c8   : > { %v1261_v27 = vmul.f32 %v1260_v26, %v1254_v17 }
 0x5ca   : > { %v1262_v29 = vadd.f32 1e-05, %v1261_v27 }
 0x5cc   : > { %1680 = vrsqrt.f32 %v1262_v29  ;;  %vm1269_vm8 = vweird.f32 %v1262_v29 }
 0x5d2   : > { %v1681_v30 = vpop.eup %1680 }
 0x5d3   : > { %v1264_v32 = vmul.f32 %v1681_v30, %v1262_v29  ;;  %vm1270_vm7 = vweird.f32 %v1681_v30 }
 0x5d4   : > { %vm1271_vm9 = vmor %vm1269_vm8, %vm1270_vm7 }
 0x5d5   : > { %v1265_v33 = vmul.f32 %v1681_v30, %v1264_v32 }
 0x5d7   : > { %v1266_v34 = vmul.f32 0.5, %v1265_v33 }
 0x5d9   : > { %v1267_v35 = vsub.f32 1.5, %v1266_v34 }
 0x5db   : > { %v1268_v36 = vmul.f32 %v1681_v30, %v1267_v35 }
 0x5dd   : > { %v1272_v38 = vsel %vm1271_vm9, %v1681_v30, %v1268_v36 }
 0x5de   : > { %v1273_v41 = vmul.f32 %v1272_v38, %v1256_v21 }
 0x5e0   : > { %v1278_v42 = vmul.f32 %v1656_v37, %v1273_v41 }
 0x5e2   : > { %v1283_v43 = vadd.f32 %v1657_v39, %v1278_v42 }
 0x5e4   : > { %v1284_v44 = vpack.c.bf16 %v1283_v43, %v1283_v43 }
 0x5e6   : > { %1539 = vmatmul.msk.bf16.vlgmr.msra.gmra.mxu2 %vm476_vm0, %v1284_v44 }
 0x669   : > { %v1317_v48 = vpop.f32.mrf.mxu2 }
 0x66a   : > { %v1318_v49 = vadd.f32 %v1658_v47, %v1317_v48 }
 0x66c   : > { %v1321_v1 = vmax.f32 %v1318_v49, 0.0 }
 0x66e   : > { %v1322_v50 = vpack.c.bf16 %v1321_v1, %v1321_v1 }
 0x670   : > { %1556 = vmatmul.msk.bf16.vlgmr.msra.gmra.mxu3 %vm1359_vm10, %v1322_v50 }
 0x671   : > { %v1319_v51 = vpop.f32.mrf.mxu2 }
 0x6f3   : > { %v1372_v52 = vpop.f32.mrf.mxu3 }
 0x6f4   : > { %v1373_v20 = vadd.f32 %v1659_v7, %v1372_v52 }
 0x6f6   : > { %v1376_v53 = vadd.f32 %v1373_v20, %v1283_v43 }
 0x6f8   : > { %v1377_v54 = vsel %vm476_vm0, %v1376_v53, 0.0 }
 0x6f9   : > { %1378 = vadd.xlane.f32.xlu0 %v1377_v54 }
 0x6fb   : > { %v1374_v55 = vpop.f32.mrf.mxu3 }
 0x76c   : > { %v1379_v56 = vpop.xlane.xlu0 %1378 }
 0x76d   : > { %v1380_v57 = vmul.f32 %v1379_v56, %v1254_v17 }
 0x76f   : > { %v1381_v15 = vsub.f32 %v1376_v53, %v1380_v57 }
 0x771   : > { %v1382_v40 = vmul.f32 %v1381_v15, %v1381_v15 }
 0x773   : > { %v1383_v58 = vsel %vm476_vm0, %v1382_v40, 0.0 }
 0x774   : > { %1384 = vadd.xlane.f32.xlu0 %v1383_v58 }
 0x7e7   : > { %v1385_v59 = vpop.xlane.xlu0 %1384 }
 0x7e8   : > { %v1386_v60 = vmul.f32 %v1385_v59, %v1254_v17 }
 0x7ea   : > { %v1387_v61 = vadd.f32 1e-05, %v1386_v60 }
 0x7ec   : > { %1682 = vrsqrt.f32 %v1387_v61  ;;  %vm1394_vm12 = vweird.f32 %v1387_v61 }
 0x7f2   : > { %v1683_v31 = vpop.eup %1682 }
 0x7f3   : > { %v1389_v62 = vmul.f32 %v1683_v31, %v1387_v61  ;;  %vm1395_vm11 = vweird.f32 %v1683_v31 }
 0x7f4   : > { %vm1396_vm13 = vmor %vm1394_vm12, %vm1395_vm11 }
 0x7f5   : > { %v1390_v63 = vmul.f32 %v1683_v31, %v1389_v62 }
 0x7f7   : > { %v1391_v0 = vmul.f32 0.5, %v1390_v63 }
 0x7f9   : > { %v1392_v3 = vsub.f32 1.5, %v1391_v0 }
 0x7fb   : > { %v1393_v4 = vmul.f32 %v1683_v31, %v1392_v3 }
 0x7fd   : > { %v1397_v6 = vsel %vm1396_vm13, %v1683_v31, %v1393_v4 }
 0x7fe   : > { %v1398_v13 = vmul.f32 %v1397_v6, %v1381_v15 }
 0x800   : > { %v1403_v8 = vmul.f32 %v1660_v5, %v1398_v13 }
 0x802   : > { %v1408_v9 = vadd.f32 %v1661_v10, %v1403_v8 }
 0x804   : > { %1409 = vst.msk [vmem:[%s448_s22] sm:$0xff] %vm476_vm0, %v1408_v9 }
 0x805   : > { %1741 = shalt.err (!%p1738_p8)
}
 0x806   : > { %1575 = dma.vmem_to_hbm [thread:$0]  (%p1904_p5), %s1424_s29, 128, %s1426_s0, %s1411_s27  }
 0x807 PF: > { %p1587_p9 = scmp.ge.s32.totalorder %s1780_s28, 2  ;;  %s1437_s24 = sand.u32 1, %s1768_s25  }
 0x808   : > { %s1438_s23 = scalar_lea.sflag [#allocation4], %s1437_s24 }
 0x809   : > { %p1582_p10 = pnand %p1587_p9, %p1908_p6 }
 0x80b   : > { %p1583_p11 = pneg %p1582_p10 }
 0x80d   : > { %1763 = dma.done.wait (%p1583_p11), %s1438_s23, 128  }
 0x80e   : > { %1765 = vsyncadd (%p1583_p11), %s1438_s23, 4294967168  ;;  %s2258_s22 = sld [smem:[#allocation8_spill]]  ;;  %p24_p12 = scmp.ge.s32.totalorder %s1891_s14, 4  }
 0x80f   : > { %s2259_s27 = sld [smem:[#allocation9_spill]]  ;;  %s2260_s25 = smov %s1772_s26 }
 0x810   : > { %s2262_s28 = smov %s1891_s14  ;;  %26 = sbr.rel (!%p24_p12) target bundleno = 7 (0x7), region = 112 }
 0x814   : > { %s2261_s26 = smov %s2258_s22 }
 0x815   :  { %1444 = vsyncpa [#allocation3], 1 }
 0x816   :  { %1446 = vsyncpa [#allocation3 + $0x1], 1 }
 0x817   :  { %1447 = vsyncpa [#allocation4], 1 }
 0x818   :  { %1449 = vsyncpa [#allocation4 + $0x1], 1 }

</bundles_post_ra>
